<compile_context>
chip_gen: v7x
topology: tpu7x:2x2x1
jax: 0.10.0
libtpu: 0.0.40
codegen_flags: <defaults>
</compile_context>

<pallas_src>
import jax
import jax.numpy as jnp
from jax.experimental import pallas as pl
from jax.experimental.pallas import tpu as pltpu


# ----------------------------- Pallas kernel -------------------------------

def _packed_mode_contract_kernel(x_ref, w_ref, o_ref):
    """out[b] = sum_i x_re[b,i] * w_packed[0,i] + x_im[b,i] * w_packed[1,i].

    Block shapes:
      x_ref : (1, 2*Cin,  TM)   rows [0:Cin]=Re(x), [Cin:2Cin]=Im(x)
      w_ref : (2, Cin, 2*Cout, TM)
      o_ref : (1, 2*Cout, TM)   rows [0:Cout]=Re(out), [Cout:2Cout]=Im(out)
    """
    cin = w_ref.shape[1]

    def term_static(i):
        # NOTE: the (1,1,TM) -> (1,2*Cout,TM) sublane broadcast is implicit; a
        # stride-0 load (pl.ds(i, 2*Cout, stride=0)) could move it to the vld
        # slot, kept implicit here for lowering robustness.
        xr = x_ref[:, i:i + 1, :]                 # (1, 1, TM)
        xi = x_ref[:, cin + i:cin + i + 1, :]     # (1, 1, TM)
        return xr * w_ref[0, i] + xi * w_ref[1, i]  # (1, 2*Cout, TM)

    if cin <= 16:
        # Small channel counts: fully unrolled (LLO sees the whole schedule).
        acc = term_static(0)
        for i in range(1, cin):
            acc = acc + term_static(i)
    else:
        # Larger channel counts: bounded unroll to keep vreg pressure sane.
        # TODO(synk): for Cin >= ~64 an MXU path (real 2Cin x 2Cout block
        # matrix per mode chunk) would beat this VPU loop.
        def body(i, acc):
            xr = x_ref[:, pl.ds(i, 1), :]
            xi = x_ref[:, pl.ds(cin + i, 1), :]
            wa = w_ref[0, pl.ds(i, 1)]            # (1, 2*Cout, TM)
            wb = w_ref[1, pl.ds(i, 1)]
            return acc + xr * wa + xi * wb

        acc = jax.lax.fori_loop(1, cin, body, term_static(0), unroll=4)

    o_ref[...] = acc


def _pick_tile_m(m_pad, cin, cout, budget_bytes=8 * 1024 * 1024):
    """Largest mode tile (multiple of 128) whose double-buffered streams fit
    a conservative VMEM budget (safe on v5e/v6e/v7x with a 32 MiB limit)."""
    bytes_per_mode = 4 * (2 * cin + 4 * cin * cout + 2 * cout) * 2  # x+w+out, 2x buf
    cap = max(128, (budget_bytes // bytes_per_mode) // 128 * 128)
    return m_pad if m_pad <= cap else cap


def pallas_mode_contract(x_modes, w_modes):
    """Complex contraction over in-channels, per retained Fourier mode.

    x_modes : complex64 (B, Cin, m1, m2h)
    w_modes : complex64 (Cin, Cout, m1, m2h)
    returns : complex64 (B, Cout, m1, m2h)
    """
    B, Cin, m1, m2h = x_modes.shape
    Cout = w_modes.shape[1]
    M = m1 * m2h
    M_pad = ((M + 127) // 128) * 128          # pad only to the lane quantum
    TM = _pick_tile_m(M_pad, Cin, Cout)
    if M_pad % TM:
        M_pad = ((M_pad + TM - 1) // TM) * TM

    pad_m = M_pad - M

    # Pack Re/Im into the channel (sublane) axis: one stream per operand.
    xr = jnp.real(x_modes).astype(jnp.float32).reshape(B, Cin, M)
    xi = jnp.imag(x_modes).astype(jnp.float32).reshape(B, Cin, M)
    x_packed = jnp.pad(jnp.concatenate([xr, xi], axis=1),
                       ((0, 0), (0, 0), (0, pad_m)))          # (B, 2Cin, M_pad)

    wr = jnp.real(w_modes).astype(jnp.float32).reshape(Cin, Cout, M)
    wi = jnp.imag(w_modes).astype(jnp.float32).reshape(Cin, Cout, M)
    w0 = jnp.concatenate([wr, wi], axis=1)                    # (Cin, 2Cout, M)
    w1 = jnp.concatenate([-wi, wr], axis=1)
    w_packed = jnp.pad(jnp.stack([w0, w1], axis=0),
                       ((0, 0), (0, 0), (0, 0), (0, pad_m)))  # (2, Cin, 2Cout, M_pad)

    grid = (M_pad // TM, B)   # batch innermost: weight block stays resident
    out = pl.pallas_call(
        _packed_mode_contract_kernel,
        out_shape=jax.ShapeDtypeStruct((B, 2 * Cout, M_pad), jnp.float32),
        grid_spec=pltpu.PrefetchScalarGridSpec(
            num_scalar_prefetch=0,
            grid=grid,
            in_specs=[
                pl.BlockSpec((1, 2 * Cin, TM), lambda m, b: (b, 0, m)),
                pl.BlockSpec((2, Cin, 2 * Cout, TM), lambda m, b: (0, 0, 0, m)),
            ],
            out_specs=pl.BlockSpec((1, 2 * Cout, TM), lambda m, b: (b, 0, m))),
        compiler_params=pltpu.CompilerParams(
            dimension_semantics=("parallel", "parallel"),
            vmem_limit_bytes=32 * 1024 * 1024),
    )(x_packed, w_packed)

    out_re = out[:, :Cout, :M].reshape(B, Cout, m1, m2h)
    out_im = out[:, Cout:, :M].reshape(B, Cout, m1, m2h)
    return jax.lax.complex(out_re, out_im)


# --------------------- Legacy joint SpectralConv (glue) ---------------------

class JointSpectralConv2d:
    """Minimal JAX port of the legacy joint-factorized SpectralConv (2D, dense
    weights, max_n_modes == n_modes), matching the legacy forward semantics:
    rfftn -> fftshift(dim=-2) -> center-slice modes -> channel contraction
    -> scatter into zero spectrum -> fftshift -> irfftn -> + bias[indices].
    """

    def __init__(self, in_channels, out_channels, n_modes, n_layers, key,
                 fft_norm="forward"):
        self.in_channels = in_channels
        self.out_channels = out_channels
        m1, m2 = n_modes
        # legacy n_modes setter: last mode count -> m//2 + 1 (rfft redundancy)
        self.n_modes = (m1, m2 // 2 + 1)
        self.fft_norm = fft_norm
        init_std = (2.0 / (in_channels + out_channels)) ** 0.5
        k1, k2, k3 = jax.random.split(key, 3)
        wshape = (n_layers, in_channels, out_channels) + self.n_modes
        w_re = init_std * jax.random.normal(k1, wshape, dtype=jnp.float32)
        w_im = init_std * jax.random.normal(k2, wshape, dtype=jnp.float32)
        self.weight = (w_re + 1j * w_im).astype(jnp.complex64)
        self.bias = (init_std * jax.random.normal(
            k3, (n_layers, out_channels, 1, 1), dtype=jnp.float32))

    def get_weight(self, indices):
        return self.weight[indices]

    def _mode_slices(self, H, W_half):
        m1, m2h = self.n_modes
        s1 = H - min(H, m1)
        s2 = W_half - min(W_half, m2h)
        sl_h = slice(s1 // 2, H - s1 // 2) if s1 else slice(None)
        sl_w = slice(None, W_half - s2) if s2 else slice(None)
        return sl_h, sl_w

    def forward(self, x, indices=0, contract_fn=pallas_mode_contract):
        B, C, H, W = x.shape
        W_half = W // 2 + 1
        x_ft = jnp.fft.rfftn(x, axes=(-2, -1), norm=self.fft_norm)
        x_ft = jnp.fft.fftshift(x_ft, axes=(-2,))
        sl_h, sl_w = self._mode_slices(H, W_half)
        x_modes = x_ft[:, :, sl_h, sl_w]                     # (B, Cin, m1, m2h)
        w = self.get_weight(indices)                         # (Cin, Cout, m1, m2h)
        out_modes = contract_fn(x_modes, w)
        # TODO(synk): the scatter below could be fused into the kernel output
        # via input_output_aliases on a pre-zeroed padded spectrum buffer.
        out_ft = jnp.zeros((B, self.out_channels, H, W_half), dtype=jnp.complex64)
        out_ft = out_ft.at[:, :, sl_h, sl_w].set(out_modes)
        out_ft = jnp.fft.fftshift(out_ft, axes=(-2,))
        out = jnp.fft.irfftn(out_ft, s=(H, W), axes=(-2, -1), norm=self.fft_norm)
        out = out + self.bias[indices][None, ...]            # (1, Cout, 1, 1)
        return out


class SubConv:
    """JAX analogue of the PyTorch SubConv: a view onto the joint conv with a
    fixed layer index (parameters are shared with main_conv, not copied)."""

    def __init__(self, main_conv, indices):
        self.main_conv = main_conv
        self.indices = indices

    def forward(self, x, **kwargs):
        return self.main_conv.forward(x, self.indices, **kwargs)

    __call__ = forward

    @property
    def weight(self):
        return self.main_conv.get_weight(indices=self.indices)

    # TODO(synk): main_conv.transform() (resolution rescaling path) not ported;
    # only the forward hot path is implemented.


# ----------------------------- reference path -------------------------------

def _einsum_contract(x_modes, w_modes):
    return jnp.einsum("bixy,ioxy->boxy", x_modes, w_modes)


if __name__ == "__main__":
    key = jax.random.PRNGKey(0)
    k_x, k_p = jax.random.split(key)

    B, Cin, Cout, H, W = 2, 4, 4, 16, 16
    n_layers = 3
    main_conv = JointSpectralConv2d(Cin, Cout, n_modes=(8, 8),
                                    n_layers=n_layers, key=k_p)
    sub = SubConv(main_conv, indices=1)

    x = jax.random.normal(k_x, (B, Cin, H, W), dtype=jnp.float32)

    # jit the whole forward so the surrounding FFT / split / pad / scatter
    # passes are fused by XLA around the pallas_call.
    sub_fwd = jax.jit(lambda xx: sub(xx))
    y = jax.block_until_ready(sub_fwd(x))                    # Pallas-backed

    y_ref = main_conv.forward(x, indices=1, contract_fn=_einsum_contract)
    y_ref = jax.block_until_ready(y_ref)

    assert y.shape == (B, Cout, H, W)
    assert jnp.allclose(y, y_ref, atol=1e-4, rtol=1e-4), "Pallas kernel mismatch"
    print("KERNEL_OK")
</pallas_src>

<mosaic_0001>
module attributes {stable_mosaic.version = 11 : i64} {
  func.func @_packed_mode_contract_kernel(%arg0: i32, %arg1: i32, %arg2: memref<1x8x128xf32, #tpu.memory_space<vmem>>, %arg3: memref<2x4x8x128xf32, #tpu.memory_space<vmem>>, %arg4: memref<1x8x128xf32, #tpu.memory_space<vmem>>) attributes {dimension_semantics = [#tpu.dimension_semantics<parallel>, #tpu.dimension_semantics<parallel>], iteration_bounds = array<i64: 1, 2>, scalar_prefetch = 0 : i64, scratch_operands = 0 : i64, tpu.core_type = #tpu.core_type<tc>, window_params = [{transform_indices = @transform_0, window_bounds = array<i64: 1, 8, 128>}, {transform_indices = @transform_1, window_bounds = array<i64: 2, 4, 8, 128>}, {transform_indices = @transform_2, window_bounds = array<i64: 1, 8, 128>}]} {
    %c0 = arith.constant 0 : index
    %c0_0 = arith.constant 0 : index
    %c0_1 = arith.constant 0 : index
    %0 = vector.load %arg2[%c0, %c0_0, %c0_1] : memref<1x8x128xf32, #tpu.memory_space<vmem>>, vector<1x1x128xf32>
    %c0_2 = arith.constant 0 : index
    %c4 = arith.constant 4 : index
    %c0_3 = arith.constant 0 : index
    %1 = vector.load %arg2[%c0_2, %c4, %c0_3] : memref<1x8x128xf32, #tpu.memory_space<vmem>>, vector<1x1x128xf32>
    %c0_4 = arith.constant 0 : index
    %c0_5 = arith.constant 0 : index
    %c0_6 = arith.constant 0 : index
    %c0_7 = arith.constant 0 : index
    %2 = vector.load %arg3[%c0_4, %c0_5, %c0_6, %c0_7] : memref<2x4x8x128xf32, #tpu.memory_space<vmem>>, vector<1x1x8x128xf32>
    %3 = vector.shape_cast %2 : vector<1x1x8x128xf32> to vector<8x128xf32>
    %4 = vector.shape_cast %3 : vector<8x128xf32> to vector<1x8x128xf32>
    %5 = vector.broadcast %0 : vector<1x1x128xf32> to vector<1x8x128xf32>
    %6 = arith.mulf %5, %4 : vector<1x8x128xf32>
    %c1 = arith.constant 1 : index
    %c0_8 = arith.constant 0 : index
    %c0_9 = arith.constant 0 : index
    %c0_10 = arith.constant 0 : index
    %7 = vector.load %arg3[%c1, %c0_8, %c0_9, %c0_10] : memref<2x4x8x128xf32, #tpu.memory_space<vmem>>, vector<1x1x8x128xf32>
    %8 = vector.shape_cast %7 : vector<1x1x8x128xf32> to vector<8x128xf32>
    %9 = vector.shape_cast %8 : vector<8x128xf32> to vector<1x8x128xf32>
    %10 = vector.broadcast %1 : vector<1x1x128xf32> to vector<1x8x128xf32>
    %11 = arith.mulf %10, %9 : vector<1x8x128xf32>
    %12 = arith.addf %6, %11 : vector<1x8x128xf32>
    %c0_11 = arith.constant 0 : index
    %c1_12 = arith.constant 1 : index
    %c0_13 = arith.constant 0 : index
    %13 = vector.load %arg2[%c0_11, %c1_12, %c0_13] : memref<1x8x128xf32, #tpu.memory_space<vmem>>, vector<1x1x128xf32>
    %c0_14 = arith.constant 0 : index
    %c5 = arith.constant 5 : index
    %c0_15 = arith.constant 0 : index
    %14 = vector.load %arg2[%c0_14, %c5, %c0_15] : memref<1x8x128xf32, #tpu.memory_space<vmem>>, vector<1x1x128xf32>
    %c0_16 = arith.constant 0 : index
    %c1_17 = arith.constant 1 : index
    %c0_18 = arith.constant 0 : index
    %c0_19 = arith.constant 0 : index
    %15 = vector.load %arg3[%c0_16, %c1_17, %c0_18, %c0_19] : memref<2x4x8x128xf32, #tpu.memory_space<vmem>>, vector<1x1x8x128xf32>
    %16 = vector.shape_cast %15 : vector<1x1x8x128xf32> to vector<8x128xf32>
    %17 = vector.shape_cast %16 : vector<8x128xf32> to vector<1x8x128xf32>
    %18 = vector.broadcast %13 : vector<1x1x128xf32> to vector<1x8x128xf32>
    %19 = arith.mulf %18, %17 : vector<1x8x128xf32>
    %c1_20 = arith.constant 1 : index
    %c1_21 = arith.constant 1 : index
    %c0_22 = arith.constant 0 : index
    %c0_23 = arith.constant 0 : index
    %20 = vector.load %arg3[%c1_20, %c1_21, %c0_22, %c0_23] : memref<2x4x8x128xf32, #tpu.memory_space<vmem>>, vector<1x1x8x128xf32>
    %21 = vector.shape_cast %20 : vector<1x1x8x128xf32> to vector<8x128xf32>
    %22 = vector.shape_cast %21 : vector<8x128xf32> to vector<1x8x128xf32>
    %23 = vector.broadcast %14 : vector<1x1x128xf32> to vector<1x8x128xf32>
    %24 = arith.mulf %23, %22 : vector<1x8x128xf32>
    %25 = arith.addf %19, %24 : vector<1x8x128xf32>
    %26 = arith.addf %12, %25 : vector<1x8x128xf32>
    %c0_24 = arith.constant 0 : index
    %c2 = arith.constant 2 : index
    %c0_25 = arith.constant 0 : index
    %27 = vector.load %arg2[%c0_24, %c2, %c0_25] : memref<1x8x128xf32, #tpu.memory_space<vmem>>, vector<1x1x128xf32>
    %c0_26 = arith.constant 0 : index
    %c6 = arith.constant 6 : index
    %c0_27 = arith.constant 0 : index
    %28 = vector.load %arg2[%c0_26, %c6, %c0_27] : memref<1x8x128xf32, #tpu.memory_space<vmem>>, vector<1x1x128xf32>
    %c0_28 = arith.constant 0 : index
    %c2_29 = arith.constant 2 : index
    %c0_30 = arith.constant 0 : index
    %c0_31 = arith.constant 0 : index
    %29 = vector.load %arg3[%c0_28, %c2_29, %c0_30, %c0_31] : memref<2x4x8x128xf32, #tpu.memory_space<vmem>>, vector<1x1x8x128xf32>
    %30 = vector.shape_cast %29 : vector<1x1x8x128xf32> to vector<8x128xf32>
    %31 = vector.shape_cast %30 : vector<8x128xf32> to vector<1x8x128xf32>
    %32 = vector.broadcast %27 : vector<1x1x128xf32> to vector<1x8x128xf32>
    %33 = arith.mulf %32, %31 : vector<1x8x128xf32>
    %c1_32 = arith.constant 1 : index
    %c2_33 = arith.constant 2 : index
    %c0_34 = arith.constant 0 : index
    %c0_35 = arith.constant 0 : index
    %34 = vector.load %arg3[%c1_32, %c2_33, %c0_34, %c0_35] : memref<2x4x8x128xf32, #tpu.memory_space<vmem>>, vector<1x1x8x128xf32>
    %35 = vector.shape_cast %34 : vector<1x1x8x128xf32> to vector<8x128xf32>
    %36 = vector.shape_cast %35 : vector<8x128xf32> to vector<1x8x128xf32>
    %37 = vector.broadcast %28 : vector<1x1x128xf32> to vector<1x8x128xf32>
    %38 = arith.mulf %37, %36 : vector<1x8x128xf32>
    %39 = arith.addf %33, %38 : vector<1x8x128xf32>
    %40 = arith.addf %26, %39 : vector<1x8x128xf32>
    %c0_36 = arith.constant 0 : index
    %c3 = arith.constant 3 : index
    %c0_37 = arith.constant 0 : index
    %41 = vector.load %arg2[%c0_36, %c3, %c0_37] : memref<1x8x128xf32, #tpu.memory_space<vmem>>, vector<1x1x128xf32>
    %c0_38 = arith.constant 0 : index
    %c7 = arith.constant 7 : index
    %c0_39 = arith.constant 0 : index
    %42 = vector.load %arg2[%c0_38, %c7, %c0_39] : memref<1x8x128xf32, #tpu.memory_space<vmem>>, vector<1x1x128xf32>
    %c0_40 = arith.constant 0 : index
    %c3_41 = arith.constant 3 : index
    %c0_42 = arith.constant 0 : index
    %c0_43 = arith.constant 0 : index
    %43 = vector.load %arg3[%c0_40, %c3_41, %c0_42, %c0_43] : memref<2x4x8x128xf32, #tpu.memory_space<vmem>>, vector<1x1x8x128xf32>
    %44 = vector.shape_cast %43 : vector<1x1x8x128xf32> to vector<8x128xf32>
    %45 = vector.shape_cast %44 : vector<8x128xf32> to vector<1x8x128xf32>
    %46 = vector.broadcast %41 : vector<1x1x128xf32> to vector<1x8x128xf32>
    %47 = arith.mulf %46, %45 : vector<1x8x128xf32>
    %c1_44 = arith.constant 1 : index
    %c3_45 = arith.constant 3 : index
    %c0_46 = arith.constant 0 : index
    %c0_47 = arith.constant 0 : index
    %48 = vector.load %arg3[%c1_44, %c3_45, %c0_46, %c0_47] : memref<2x4x8x128xf32, #tpu.memory_space<vmem>>, vector<1x1x8x128xf32>
    %49 = vector.shape_cast %48 : vector<1x1x8x128xf32> to vector<8x128xf32>
    %50 = vector.shape_cast %49 : vector<8x128xf32> to vector<1x8x128xf32>
    %51 = vector.broadcast %42 : vector<1x1x128xf32> to vector<1x8x128xf32>
    %52 = arith.mulf %51, %50 : vector<1x8x128xf32>
    %53 = arith.addf %47, %52 : vector<1x8x128xf32>
    %54 = arith.addf %40, %53 : vector<1x8x128xf32>
    %c0_48 = arith.constant 0 : index
    %c0_49 = arith.constant 0 : index
    %c0_50 = arith.constant 0 : index
    %55 = vector.load %arg4[%c0_48, %c0_49, %c0_50] : memref<1x8x128xf32, #tpu.memory_space<vmem>>, vector<1x8x128xf32>
    tpu.vector_store %arg4[%c0_48, %c0_49, %c0_50], %54 {strides = array<i32>} : memref<1x8x128xf32, #tpu.memory_space<vmem>>, vector<1x8x128xf32>,
    return
  }
  func.func @transform_0(%arg0: i32, %arg1: i32) -> (i32, i32, i32) {
    %c0_i32 = arith.constant 0 : i32
    %c0_i32_0 = arith.constant 0 : i32
    return %arg1, %c0_i32, %arg0 : i32, i32, i32
  }
  func.func @transform_1(%arg0: i32, %arg1: i32) -> (i32, i32, i32, i32) {
    %c0_i32 = arith.constant 0 : i32
    %c0_i32_0 = arith.constant 0 : i32
    %c0_i32_1 = arith.constant 0 : i32
    %c0_i32_2 = arith.constant 0 : i32
    return %c0_i32, %c0_i32_0, %c0_i32_1, %arg0 : i32, i32, i32, i32
  }
  func.func @transform_2(%arg0: i32, %arg1: i32) -> (i32, i32, i32) {
    %c0_i32 = arith.constant 0 : i32
    %c0_i32_0 = arith.constant 0 : i32
    return %arg1, %c0_i32, %arg0 : i32, i32, i32
  }
}

</mosaic_0001>

<bundles_post_ra>
// kernel: reverse.1
= control target key start
LH: loop header
LB: loop body
LE: loop exit
PB: predicated region body
PF: predicated region fallthrough
CT: control target
= control target key end

     0   :  { %v71_v3 = vlaneseq  ;;  %v64_v9 = vld [vmem:[#allocation0 + $0x7] ss:$-1 sm:$0xff]  ;;  %v78_v12 = vld [vmem:[#allocation0 + $0x17] ss:$-1 sm:$0xff]  ;;  %s329_s0 = inlined_call_operand.vmem [shape: f32[2,4,16,7], index: 0, kind: input, shape index: {}]   ;;  %s330_s1 = inlined_call_operand.vmem [shape: f32[2,4,16,7], index: 1, kind: output, shape index: {}]  }
   0x1   :  { %v44_v0 = vld [vmem:[%s329_s0] sm:$0xff]  ;;  %v46_v1 = vld [vmem:[%s329_s0 + $0x8] sm:$0xff]  ;;  %v48_v2 = vld [vmem:[%s329_s0 + $0x10] sm:$0xff]  ;;  %v65_v10 = vrot.slane %v64_v9, 1  ;;  %v79_v14 = vrot.slane %v78_v12, 1 }
   0x2   :  { %45 = vst [vmem:[#allocation0 + $0x8] sm:$0xff] %v44_v0  ;;  %47 = vst [vmem:[#allocation0 + $0x18] sm:$0xff] %v46_v1  ;;  %v50_v4 = vld [vmem:[%s329_s0 + $0x18] sm:$0xff]  ;;  %v52_v5 = vld [vmem:[%s329_s0 + $0x20] sm:$0xff]  ;;  %v72_v11 = vshrl.u32 %v71_v3, 7 }
   0x3   :  { %49 = vst [vmem:[#allocation0 + $0x28] sm:$0xff] %v48_v2  ;;  %v54_v6 = vld [vmem:[%s329_s0 + $0x28] sm:$0xff]  ;;  %51 = vst [vmem:[#allocation0 + $0x38] sm:$0xff] %v50_v4  ;;  %v56_v7 = vld [vmem:[%s329_s0 + $0x30] sm:$0xff] }
   0x4   :  { %53 = vst [vmem:[#allocation0 + $0x48] sm:$0xff] %v52_v5  ;;  %55 = vst [vmem:[#allocation0 + $0x58] sm:$0xff] %v54_v6  ;;  %v58_v8 = vld [vmem:[%s329_s0 + $0x38] sm:$0xff]  ;;  %v92_v13 = vld [vmem:[#allocation0 + $0x27] ss:$-1 sm:$0xff]  ;;  %vm73_vm0 = vcmp.lt.s32.totalorder %v72_v11, 7 }
   0x5   :  { %57 = vst [vmem:[#allocation0 + $0x68] sm:$0xff] %v56_v7  ;;  %59 = vst [vmem:[#allocation0 + $0x78] sm:$0xff] %v58_v8  ;;  %v93_v15 = vrot.slane %v92_v13, 1  ;;  %v106_v16 = vld [vmem:[#allocation0 + $0x37] ss:$-1 sm:$0xff] }
   0x6   :  { %66 = vst [vmem:[#allocation1] sm:$0xff] %v65_v10  ;;  %v107_v17 = vrot.slane %v106_v16, 1  ;;  %v120_v18 = vld [vmem:[#allocation0 + $0x47] ss:$-1 sm:$0xff]  ;;  %v134_v19 = vld [vmem:[#allocation0 + $0x57] ss:$-1 sm:$0xff] }
   0x7   :  { %80 = vst [vmem:[#allocation1 + $0x8] sm:$0xff] %v79_v14  ;;  %94 = vst [vmem:[#allocation1 + $0x10] sm:$0xff] %v93_v15  ;;  %v121_v20 = vrot.slane %v120_v18, 1  ;;  %v135_v21 = vrot.slane %v134_v19, 1  ;;  %v148_v22 = vld [vmem:[#allocation0 + $0x67] ss:$-1 sm:$0xff] }
   0x8   :  { %v162_v23 = vld [vmem:[#allocation0 + $0x77] ss:$-1 sm:$0xff]  ;;  %108 = vst [vmem:[#allocation1 + $0x18] sm:$0xff] %v107_v17  ;;  %v149_v24 = vrot.slane %v148_v22, 1 }
   0x9   :  { %v163_v25 = vrot.slane %v162_v23, 1  ;;  %v69_v26 = vld [vmem:[#allocation0 + $0xf] ss:$-1 sm:$0xff]  ;;  %v83_v27 = vld [vmem:[#allocation0 + $0x1f] ss:$-1 sm:$0xff]  ;;  %122 = vst [vmem:[#allocation1 + $0x20] sm:$0xff] %v121_v20 }
   0xa   :  { %v97_v28 = vld [vmem:[#allocation0 + $0x2f] ss:$-1 sm:$0xff]  ;;  %136 = vst [vmem:[#allocation1 + $0x28] sm:$0xff] %v135_v21  ;;  %v70_v29 = vrot.slane %v69_v26, 1  ;;  %v84_v30 = vrot.slane %v83_v27, 1  ;;  %150 = vst [vmem:[#allocation1 + $0x30] sm:$0xff] %v149_v24 }
   0xb   :  { %v98_v31 = vrot.slane %v97_v28, 1  ;;  %v111_v32 = vld [vmem:[#allocation0 + $0x3f] ss:$-1 sm:$0xff]  ;;  %164 = vst [vmem:[#allocation1 + $0x38] sm:$0xff] %v163_v25  ;;  %v125_v34 = vld [vmem:[#allocation0 + $0x4f] ss:$-1 sm:$0xff] }
   0xc   :  { %v112_v33 = vrot.slane %v111_v32, 1  ;;  %v139_v35 = vld [vmem:[#allocation0 + $0x5f] ss:$-1 sm:$0xff]  ;;  %74 = vst.msk [vmem:[#allocation1] sm:$0xff] %vm73_vm0, %v70_v29  ;;  %88 = vst.msk [vmem:[#allocation1 + $0x8] sm:$0xff] %vm73_vm0, %v84_v30  ;;  %v126_v36 = vrot.slane %v125_v34, 1 }
   0xd   :  { %102 = vst.msk [vmem:[#allocation1 + $0x10] sm:$0xff] %vm73_vm0, %v98_v31  ;;  %v140_v37 = vrot.slane %v139_v35, 1  ;;  %v153_v38 = vld [vmem:[#allocation0 + $0x6f] ss:$-1 sm:$0xff]  ;;  %v167_v39 = vld [vmem:[#allocation0 + $0x7f] ss:$-1 sm:$0xff] }
   0xe   :  { %116 = vst.msk [vmem:[#allocation1 + $0x18] sm:$0xff] %vm73_vm0, %v112_v33  ;;  %v154_v40 = vrot.slane %v153_v38, 1  ;;  %v168_v41 = vrot.slane %v167_v39, 1  ;;  %130 = vst.msk [vmem:[#allocation1 + $0x20] sm:$0xff] %vm73_vm0, %v126_v36 }
   0xf   :  { %144 = vst.msk [vmem:[#allocation1 + $0x28] sm:$0xff] %vm73_vm0, %v140_v37 }
  0x10   :  { %158 = vst.msk [vmem:[#allocation1 + $0x30] sm:$0xff] %vm73_vm0, %v154_v40  ;;  %172 = vst.msk [vmem:[#allocation1 + $0x38] sm:$0xff] %vm73_vm0, %v168_v41 }
  0x13   :  { %v214_v42 = vld [vmem:[#allocation1] sm:$0xff]  ;;  %v216_v43 = vld [vmem:[#allocation1 + $0x8] sm:$0xff] }
  0x14   :  { %v218_v44 = vld [vmem:[#allocation1 + $0x10] sm:$0xff]  ;;  %215 = vst [vmem:[%s330_s1] sm:$0xff] %v214_v42  ;;  %217 = vst [vmem:[%s330_s1 + $0x8] sm:$0xff] %v216_v43 }
  0x15   :  { %219 = vst [vmem:[%s330_s1 + $0x10] sm:$0xff] %v218_v44  ;;  %v220_v45 = vld [vmem:[#allocation1 + $0x18] sm:$0xff]  ;;  %v222_v46 = vld [vmem:[#allocation1 + $0x20] sm:$0xff] }
  0x16   :  { %221 = vst [vmem:[%s330_s1 + $0x18] sm:$0xff] %v220_v45  ;;  %v224_v47 = vld [vmem:[#allocation1 + $0x28] sm:$0xff]  ;;  %223 = vst [vmem:[%s330_s1 + $0x20] sm:$0xff] %v222_v46 }
  0x17   :  { %225 = vst [vmem:[%s330_s1 + $0x28] sm:$0xff] %v224_v47  ;;  %v226_v48 = vld [vmem:[#allocation1 + $0x30] sm:$0xff]  ;;  %v228_v49 = vld [vmem:[#allocation1 + $0x38] sm:$0xff] }
  0x18   :  { %227 = vst [vmem:[%s330_s1 + $0x30] sm:$0xff] %v226_v48  ;;  %229 = vst [vmem:[%s330_s1 + $0x38] sm:$0xff] %v228_v49 }

// kernel: _lambda_.1
= control target key start
LH: loop header
LB: loop body
LE: loop exit
PB: predicated region body
PF: predicated region fallthrough
CT: control target
= control target key end

     0   :  { %s436_s9 = smov 0   ;;  %s438_s10 = smov 0   ;;  %s500_s0 = inlined_call_operand.vmem [shape: f32[2,8,128], index: 0, kind: input, shape index: {}]   ;;  %s501_s1 = inlined_call_operand.vmem [shape: f32[2,4,8,128], index: 1, kind: input, shape index: {}]   ;;  %s502_s2 = inlined_call_operand.vmem [shape: f32[2,8,128], index: 2, kind: output, shape index: {}]  }
   0x1   :  { %s440_s11 = smov 0  }
   0x2 LB: > { %s21_s12 = sadd.s32 1, %s415_s10  ;;  %p353_p0 = scmp.ge.s32.totalorder %s419_s11, 1  ;;  %s419_s11 = sphi %s440_s11, %s12_s11   ;;  %s415_s10 = sphi %s438_s10, %s504_s10   ;;  %s411_s9 = sphi %s436_s9, %s503_s9  }
   0x3   : > { %p22_p1 = scmp.ge.s32.totalorder %s21_s12, 2  ;;  %p139_p2 = scmp.lt.s32.totalorder %s419_s11, 3 }
   0x5   : > { %s506_s12 = smov (%p22_p1, %s21_s12), 0  ;;  %p140_p3 = pnand %p353_p0, %p139_p2 }
   0x6   : > { %p169_p4 = scmp.lt.s32.totalorder (!%p140_p3), %s411_s9, 1  ;;  %v189_v0 = vld [vmem:[%s501_s1] sm:$0xff] (!%p140_p3)  ;;  %v359_v2 = vld [vmem:[%s501_s1 + $0x8] sm:$0xff] (!%p140_p3)  ;;  %v363_v4 = vld [vmem:[%s501_s1 + $0x10] sm:$0xff] (!%p140_p3) }
   0x7   : > { %143 = sbr.rel (%p140_p3) target bundleno = 30 (0x1e), region = 28  ;;  %v357_v1 = vld [vmem:[%s501_s1 + $0x20] sm:$0xff] (!%p140_p3)  ;;  %v361_v3 = vld [vmem:[%s501_s1 + $0x28] sm:$0xff] (!%p140_p3)  ;;  %v365_v5 = vld [vmem:[%s501_s1 + $0x30] sm:$0xff] (!%p140_p3) }
   0x8   : > { %v367_v6 = vld [vmem:[%s501_s1 + $0x18] sm:$0xff] (!%p140_p3) }
   0x9   : > { %v369_v7 = vld [vmem:[%s501_s1 + $0x38] sm:$0xff] (!%p140_p3) }
   0xe   : > { %s508_s9 = smov (!%p169_p4, %s411_s9), 1 }
   0xf   : > { %s354_s17 = sshll.u32 %s508_s9, 3 }
  0x10   : > { %s175_s26 = scalar_lea.vmem %s500_s0, %s354_s17  ;;  %s186_s7 = scalar_lea.vmem %s502_s2, %s354_s17 }
  0x11   : > { %v356_v8 = vld [vmem:[%s175_s26] ss:$0 sm:$0xff]  ;;  %v358_v9 = vld [vmem:[%s175_s26 + $0x4] ss:$0 sm:$0xff]  ;;  %v360_v10 = vld [vmem:[%s175_s26 + $0x1] ss:$0 sm:$0xff] }
  0x12   : > { %v194_v11 = vmul.f32 %v356_v8, %v189_v0  ;;  %v201_v12 = vmul.f32 %v358_v9, %v357_v1  ;;  %v362_v13 = vld [vmem:[%s175_s26 + $0x5] ss:$0 sm:$0xff]  ;;  %v211_v14 = vmul.f32 %v360_v10, %v359_v2  ;;  %v364_v15 = vld [vmem:[%s175_s26 + $0x2] ss:$0 sm:$0xff]  ;;  %v366_v16 = vld [vmem:[%s175_s26 + $0x6] ss:$0 sm:$0xff] }
  0x13   : > { %v218_v17 = vmul.f32 %v362_v13, %v361_v3  ;;  %v229_v18 = vmul.f32 %v364_v15, %v363_v4  ;;  %v236_v19 = vmul.f32 %v366_v16, %v365_v5  ;;  %v368_v20 = vld [vmem:[%s175_s26 + $0x3] ss:$0 sm:$0xff]  ;;  %v370_v21 = vld [vmem:[%s175_s26 + $0x7] ss:$0 sm:$0xff] }
  0x14   : > { %v202_v22 = vadd.f32 %v201_v12, %v194_v11  ;;  %v247_v23 = vmul.f32 %v368_v20, %v367_v6  ;;  %v254_v24 = vmul.f32 %v370_v21, %v369_v7 }
  0x15   : > { %v219_v25 = vadd.f32 %v218_v17, %v211_v14  ;;  %v237_v26 = vadd.f32 %v236_v19, %v229_v18 }
  0x16   : > { %v255_v28 = vadd.f32 %v254_v24, %v247_v23 }
  0x17   : > { %v220_v27 = vadd.f32 %v219_v25, %v202_v22 }
  0x19   : > { %v238_v29 = vadd.f32 %v237_v26, %v220_v27 }
  0x1b   : > { %v256_v30 = vadd.f32 %v255_v28, %v238_v29 }
  0x1d   : > { %257 = vst [vmem:[%s186_s7] sm:$0xff] %v256_v30 }
  0x1e PF: > { %s12_s11 = sadd.s32 1, %s419_s11   ;;  %s503_s9 = smov %s415_s10 }
  0x1f   : > { %p9_p5 = scmp.ge.s32.totalorder %s12_s11, 4   ;;  %s504_s10 = smov %s506_s12 }
  0x21   :  { %11 = sbr.rel (!%p9_p5) target bundleno = 2 (0x2), region = 68 }

</bundles_post_ra>
